<compile_context>
chip_gen: v7x
topology: tpu7x:2x2x1
jax: 0.10.0
libtpu: 0.0.40
codegen_flags: <defaults>
</compile_context>

<pallas_src>
import functools

import jax
import jax.numpy as jnp
from jax.experimental import pallas as pl
from jax.experimental.pallas import tpu as pltpu

LANES = 128
BOXES_PER_ROW = LANES // 4  # 32 boxes (x1,y1,x2,y2) per lane-dense row


def _round_up(x, m):
    return ((x + m - 1) // m) * m


def _width_loss_kernel(o_ref, p_ref, acc_ref, *, steps, bm, rows):
    c = pl.program_id(0)          # slice axis (one per TensorCore on v7x)
    s = pl.program_id(1)          # "arbitrary" streaming-reduction axis

    @pl.when(s == 0)
    def _init():
        acc_ref[...] = jnp.zeros_like(acc_ref)

    # Lane-dense [bm, 128] block of (output - prev); native dtype was DMA'd,
    # cast to f32 on the VPU (hidden under the HBM stream).
    d = o_ref[...].astype(jnp.float32) - p_ref[...].astype(jnp.float32)

    # Flat layout: box i occupies lanes 4i..4i+3 = (x1,y1,x2,y2) within a row.
    # e = d - roll(d, 2) puts dw_i at lane 4i+2 and dh_i at lane 4i+3 (roll is
    # XLU slot -> free w.r.t. VALU/load slots).  Junk lanes (lane%4 < 2, incl.
    # the per-row wrap-around at lanes 0/1) stay finite here and are zeroed
    # once, post-reduce, in the wrapper epilogue -- not per data vreg.
    e = d - pltpu.roll(d, shift=2, axis=1)
    sq = e * e

    block_id = c * steps + s      # un-clamped logical block id
    row0 = block_id * bm

    def _accum(vals):
        # Per-vreg accumulation: fold the bm/8 (8,128) vregs with plain VPU
        # adds; keep the (8,128) shape (no cross-sublane collapse, full-vreg
        # accumulator store).
        acc_ref[...] += vals.reshape(bm // 8, 8, LANES).sum(axis=0)[None]

    # Only the tail block(s) pay for row masking.
    is_ragged = row0 + bm > rows

    @pl.when(jnp.logical_not(is_ragged))
    def _interior():
        _accum(sq)

    @pl.when(is_ragged)
    def _tail():
        # Rows past `rows` (ragged final tile / clamped duplicate block) hold
        # unspecified VMEM data; select (not multiply) them to exact zero.
        r = row0 + jax.lax.broadcasted_iota(jnp.int32, (bm, 1), 0)
        _accum(jnp.where(r < rows, sq, 0.0))


def _pairwise_sq_sum(output, prev):
    """sum((out_w-prev_w)^2) + sum((out_h-prev_h)^2) in f32 (pure jnp)."""
    o = output.astype(jnp.float32)
    p = prev.astype(jnp.float32)
    dw = (o[:, 2] - o[:, 0]) - (p[:, 2] - p[:, 0])
    dh = (o[:, 3] - o[:, 1]) - (p[:, 3] - p[:, 1])
    return jnp.sum(dw * dw) + jnp.sum(dh * dh)


def _is_v7x():
    try:
        kind = jax.devices()[0].device_kind.lower()
    except Exception:
        return False
    return "v7" in kind or "7x" in kind


def width_loss(output, prev, *, max_block_rows=4096, small_n_elements=128 * 1024):
    """Width_Loss forward.  output, prev: [N, 4] boxes -> scalar f32 loss."""
    assert output.shape == prev.shape
    assert output.ndim == 2 and output.shape[-1] == 4
    n = output.shape[0]
    if n == 0:
        # Matches the PyTorch module: sum(empty)/0 -> nan.
        return jnp.float32(float("nan"))

    # Small-N fast path: a standalone pallas_call costs a few us of launch +
    # pipeline fill; tracker-sized batches are strictly faster fused into XLA.
    if 4 * n < small_n_elements or n < BOXES_PER_ROW:
        return _pairwise_sq_sum(output, prev) / jnp.float32(2 * n)

    # Lane-dense view, NO jnp.pad: stream the 128-aligned prefix (zero-copy
    # bitcast reshape when N % 32 == 0) and fold the <32-box remainder into
    # the tiny jnp epilogue below.
    n_main = (n // BOXES_PER_ROW) * BOXES_PER_ROW
    n_rem = n - n_main
    rows = (4 * n_main) // LANES

    itemsize = min(jnp.dtype(output.dtype).itemsize, jnp.dtype(prev.dtype).itemsize)
    sub = {4: 8, 2: 16, 1: 32}.get(itemsize, 8)   # sublane granularity per dtype

    # N-aware block size: big enough to amortize the ~0.35us/step overhead,
    # small enough that 2 inputs x double-buffer stays within v5e's 16 MiB
    # scoped VMEM (bm=4096 f32 -> 8 MiB of input buffers).
    bm_cap = max(sub, (max_block_rows // sub) * sub)
    want_slices = 2 if rows >= 2 * sub else 1
    bm = min(bm_cap, _round_up(-(-rows // want_slices), sub))
    num_blocks = -(-rows // bm)
    num_slices = 2 if num_blocks >= 2 else 1
    steps = -(-num_blocks // num_slices)
    last_block = num_blocks - 1

    o2 = (output[:n_main] if n_rem else output).reshape(rows, LANES)
    p2 = (prev[:n_main] if n_rem else prev).reshape(rows, LANES)

    def in_map(c, s):
        # Clamp so any excess block (num_slices*steps > num_blocks) re-reads the
        # last in-bounds block; its contribution is fully row-masked in-kernel.
        return (jnp.minimum(c * steps + s, last_block), 0)

    if num_slices == 2 and _is_v7x() and hasattr(pltpu, "CORE_PARALLEL"):
        dims = (pltpu.CORE_PARALLEL, pltpu.ARBITRARY)   # shard across both TCs
    else:
        dims = ("parallel", "arbitrary")

    kernel = functools.partial(_width_loss_kernel, steps=steps, bm=bm, rows=rows)

    partials = pl.pallas_call(
        kernel,
        out_shape=jax.ShapeDtypeStruct((num_slices, 8, LANES), jnp.float32),
        grid_spec=pltpu.PrefetchScalarGridSpec(
            num_scalar_prefetch=0,
            grid=(num_slices, steps),
            in_specs=[
                pl.BlockSpec((bm, LANES), in_map),
                pl.BlockSpec((bm, LANES), in_map),
            ],
            out_specs=pl.BlockSpec((1, 8, LANES), lambda c, s: (c, 0, 0)),
        ),
        compiler_params=pltpu.CompilerParams(dimension_semantics=dims),
        # TODO(synk): sweep pipeline_mode=pl.Buffered(3) on the input specs once
        # per-generation VMEM budgets are plumbed (v5e 16 MiB scoped limit).
    )(o2, p2)

    # Tiny epilogue (fused by XLA): hoisted lane mask, (S,8,128) reduce,
    # optional <32-box remainder, and the /(2N).
    lane = jnp.arange(LANES, dtype=jnp.int32)
    total_sq = jnp.sum(jnp.where((lane % 4) >= 2, partials, jnp.float32(0.0)))
    if n_rem:
        total_sq = total_sq + _pairwise_sq_sum(output[n_main:], prev[n_main:])
    return total_sq / jnp.float32(2 * n)


def _width_loss_ref(output, prev):
    """Pure-JAX reference mirroring the PyTorch module exactly."""
    out_w = output[:, 2] - output[:, 0]
    out_h = output[:, 3] - output[:, 1]
    prev_w = prev[:, 2] - prev[:, 0]
    prev_h = prev[:, 3] - prev[:, 1]
    diff = jnp.concatenate([out_w - prev_w, out_h - prev_h], axis=0)
    sq = diff.astype(jnp.float32) ** 2
    return jnp.sum(sq) / sq.shape[0]


if __name__ == "__main__":
    key = jax.random.PRNGKey(0)
    ks = jax.random.split(key, 8)

    # (1) Forced kernel path, small shape: 256 boxes -> rows=32, grid=(2,1).
    n1 = 256
    o1 = jax.random.uniform(ks[0], (n1, 4), jnp.float32) * 100.0
    p1 = jax.random.uniform(ks[1], (n1, 4), jnp.float32) * 100.0
    l1 = width_loss(o1, p1, small_n_elements=0)
    jax.block_until_ready(l1)
    r1 = _width_loss_ref(o1, p1)
    assert jnp.allclose(l1, r1, rtol=1e-5, atol=1e-4), (l1, r1)

    # (2) Forced kernel, tiny blocks: 2-slice grid=(2,2), ragged final block,
    #     one clamped duplicate block, multi-step accumulation, 17-box remainder.
    n2 = 4113   # n_main=4096 -> rows=128; bm=48 -> 3 real blocks
    o2 = jax.random.uniform(ks[2], (n2, 4), jnp.float32) * 100.0
    p2 = jax.random.uniform(ks[3], (n2, 4), jnp.float32) * 100.0
    l2 = width_loss(o2, p2, max_block_rows=48, small_n_elements=0)
    jax.block_until_ready(l2)
    r2 = _width_loss_ref(o2, p2)
    assert jnp.allclose(l2, r2, rtol=1e-4, atol=1e-3), (l2, r2)

    # (3) Native bf16 passthrough (16-row sublane granularity, no wrapper cast).
    n3 = 512
    o3 = (jax.random.uniform(ks[4], (n3, 4), jnp.float32) * 100.0).astype(jnp.bfloat16)
    p3 = (jax.random.uniform(ks[5], (n3, 4), jnp.float32) * 100.0).astype(jnp.bfloat16)
    l3 = width_loss(o3, p3, small_n_elements=0)
    jax.block_until_ready(l3)
    r3 = _width_loss_ref(o3.astype(jnp.float32), p3.astype(jnp.float32))
    assert jnp.allclose(l3, r3, rtol=1e-5, atol=1e-3), (l3, r3)

    # (4) Small-N fast path (what a real tracker batch hits).
    n4 = 8
    o4 = jax.random.uniform(ks[6], (n4, 4), jnp.float32) * 100.0
    p4 = jax.random.uniform(ks[7], (n4, 4), jnp.float32) * 100.0
    l4 = width_loss(o4, p4)
    jax.block_until_ready(l4)
    r4 = _width_loss_ref(o4, p4)
    assert jnp.allclose(l4, r4, rtol=1e-5, atol=1e-5), (l4, r4)

    print("KERNEL_OK")
</pallas_src>

<mosaic_0001>
module attributes {stable_mosaic.version = 11 : i64} {
  func.func @_width_loss_kernel(%arg0: i32, %arg1: i32, %arg2: memref<8x128xf32, #tpu.memory_space<vmem>>, %arg3: memref<8x128xf32, #tpu.memory_space<vmem>>, %arg4: memref<1x8x128xf32, #tpu.memory_space<vmem>>) attributes {dimension_semantics = [#tpu.dimension_semantics<parallel>, #tpu.dimension_semantics<arbitrary>], iteration_bounds = array<i64: 1, 1>, scalar_prefetch = 0 : i64, scratch_operands = 0 : i64, tpu.core_type = #tpu.core_type<tc>, window_params = [{transform_indices = @transform_0, window_bounds = array<i64: 8, 128>}, {transform_indices = @transform_1, window_bounds = array<i64: 8, 128>}, {transform_indices = @transform_2, window_bounds = array<i64: 1, 8, 128>}]} {
    %c0_i32 = arith.constant 0 : i32
    %0 = arith.cmpi eq, %arg1, %c0_i32 : i32
    %1 = arith.extui %0 : i1 to i32
    %c0_i32_0 = arith.constant 0 : i32
    %2 = arith.cmpi ne, %1, %c0_i32_0 : i32
    scf.if %2 {
      %cst = arith.constant 0.000000e+00 : f32
      %19 = vector.broadcast %cst : f32 to vector<1x8x128xf32>
      %c0_8 = arith.constant 0 : index
      %c0_9 = arith.constant 0 : index
      %c0_10 = arith.constant 0 : index
      %20 = vector.load %arg4[%c0_8, %c0_9, %c0_10] : memref<1x8x128xf32, #tpu.memory_space<vmem>>, vector<1x8x128xf32>
      tpu.vector_store %arg4[%c0_8, %c0_9, %c0_10], %19 {strides = array<i32>} : memref<1x8x128xf32, #tpu.memory_space<vmem>>, vector<1x8x128xf32>,
    } else {
    }
    %c0 = arith.constant 0 : index
    %c0_1 = arith.constant 0 : index
    %3 = vector.load %arg2[%c0, %c0_1] : memref<8x128xf32, #tpu.memory_space<vmem>>, vector<8x128xf32>
    %c0_2 = arith.constant 0 : index
    %c0_3 = arith.constant 0 : index
    %4 = vector.load %arg3[%c0_2, %c0_3] : memref<8x128xf32, #tpu.memory_space<vmem>>, vector<8x128xf32>
    %5 = arith.subf %3, %4 : vector<8x128xf32>
    %c2_i32 = arith.constant 2 : i32
    %6 = tpu.dynamic_rotate %5 by %c2_i32 dim 1 : vector<8x128xf32>, i32 -> vector<8x128xf32>
    %7 = arith.subf %5, %6 : vector<8x128xf32>
    %8 = arith.mulf %7, %7 : vector<8x128xf32>
    %c1_i32 = arith.constant 1 : i32
    %9 = arith.muli %arg0, %c1_i32 : i32
    %10 = arith.addi %9, %arg1 : i32
    %c8_i32 = arith.constant 8 : i32
    %11 = arith.muli %10, %c8_i32 : i32
    %c8_i32_4 = arith.constant 8 : i32
    %12 = arith.addi %11, %c8_i32_4 : i32
    %c8_i32_5 = arith.constant 8 : i32
    %13 = arith.cmpi sgt, %12, %c8_i32_5 : i32
    %true = arith.constant true
    %14 = arith.xori %13, %true : i1
    %15 = arith.extui %14 : i1 to i32
    %c0_i32_6 = arith.constant 0 : i32
    %16 = arith.cmpi ne, %15, %c0_i32_6 : i32
    scf.if %16 {
      %c0_8 = arith.constant 0 : index
      %c0_9 = arith.constant 0 : index
      %c0_10 = arith.constant 0 : index
      %19 = vector.load %arg4[%c0_8, %c0_9, %c0_10] : memref<1x8x128xf32, #tpu.memory_space<vmem>>, vector<1x8x128xf32>
      %20 = vector.shape_cast %8 : vector<8x128xf32> to vector<1x8x128xf32>
      %cst = arith.constant dense<0.000000e+00> : vector<8x128xf32>
      %21 = vector.multi_reduction <add>, %20, %cst [0] : vector<1x8x128xf32> to vector<8x128xf32>
      %22 = vector.shape_cast %21 : vector<8x128xf32> to vector<1x8x128xf32>
      %23 = arith.addf %19, %22 : vector<1x8x128xf32>
      %c0_11 = arith.constant 0 : index
      %c0_12 = arith.constant 0 : index
      %c0_13 = arith.constant 0 : index
      %24 = vector.load %arg4[%c0_11, %c0_12, %c0_13] : memref<1x8x128xf32, #tpu.memory_space<vmem>>, vector<1x8x128xf32>
      tpu.vector_store %arg4[%c0_11, %c0_12, %c0_13], %23 {strides = array<i32>} : memref<1x8x128xf32, #tpu.memory_space<vmem>>, vector<1x8x128xf32>,
    } else {
    }
    %17 = arith.extui %13 : i1 to i32
    %c0_i32_7 = arith.constant 0 : i32
    %18 = arith.cmpi ne, %17, %c0_i32_7 : i32
    scf.if %18 {
      %19 = tpu.iota {dimensions = array<i32: 0>} : vector<8x1xi32>
      %20 = vector.broadcast %11 : i32 to vector<8x1xi32>
      %21 = arith.addi %20, %19 : vector<8x1xi32>
      %c8_i32_8 = arith.constant 8 : i32
      %22 = vector.broadcast %c8_i32_8 : i32 to vector<8x1xi32>
      %23 = arith.cmpi slt, %21, %22 : vector<8x1xi32>
      %cst = arith.constant 0.000000e+00 : f32
      %24 = vector.shape_cast %23 : vector<8x1xi1> to vector<8x1xi1>
      %25 = vector.broadcast %24 : vector<8x1xi1> to vector<8x128xi1>
      %26 = vector.broadcast %cst : f32 to vector<8x128xf32>
      %27 = arith.select %25, %8, %26 : vector<8x128xi1>, vector<8x128xf32>
      %c0_9 = arith.constant 0 : index
      %c0_10 = arith.constant 0 : index
      %c0_11 = arith.constant 0 : index
      %28 = vector.load %arg4[%c0_9, %c0_10, %c0_11] : memref<1x8x128xf32, #tpu.memory_space<vmem>>, vector<1x8x128xf32>
      %29 = vector.shape_cast %27 : vector<8x128xf32> to vector<1x8x128xf32>
      %cst_12 = arith.constant dense<0.000000e+00> : vector<8x128xf32>
      %30 = vector.multi_reduction <add>, %29, %cst_12 [0] : vector<1x8x128xf32> to vector<8x128xf32>
      %31 = vector.shape_cast %30 : vector<8x128xf32> to vector<1x8x128xf32>
      %32 = arith.addf %28, %31 : vector<1x8x128xf32>
      %c0_13 = arith.constant 0 : index
      %c0_14 = arith.constant 0 : index
      %c0_15 = arith.constant 0 : index
      %33 = vector.load %arg4[%c0_13, %c0_14, %c0_15] : memref<1x8x128xf32, #tpu.memory_space<vmem>>, vector<1x8x128xf32>
      tpu.vector_store %arg4[%c0_13, %c0_14, %c0_15], %32 {strides = array<i32>} : memref<1x8x128xf32, #tpu.memory_space<vmem>>, vector<1x8x128xf32>,
    } else {
    }
    return
  }
  func.func @transform_0(%arg0: i32, %arg1: i32) -> (i32, i32) {
    %c1_i32 = arith.constant 1 : i32
    %0 = arith.muli %arg0, %c1_i32 : i32
    %1 = arith.addi %0, %arg1 : i32
    %c0_i32 = arith.constant 0 : i32
    %2 = arith.minsi %1, %c0_i32 : i32
    %c0_i32_0 = arith.constant 0 : i32
    %c0_i32_1 = arith.constant 0 : i32
    return %2, %c0_i32_0 : i32, i32
  }
  func.func @transform_1(%arg0: i32, %arg1: i32) -> (i32, i32) {
    %c1_i32 = arith.constant 1 : i32
    %0 = arith.muli %arg0, %c1_i32 : i32
    %1 = arith.addi %0, %arg1 : i32
    %c0_i32 = arith.constant 0 : i32
    %2 = arith.minsi %1, %c0_i32 : i32
    %c0_i32_0 = arith.constant 0 : i32
    %c0_i32_1 = arith.constant 0 : i32
    return %2, %c0_i32_0 : i32, i32
  }
  func.func @transform_2(%arg0: i32, %arg1: i32) -> (i32, i32, i32) {
    %c0_i32 = arith.constant 0 : i32
    %c0_i32_0 = arith.constant 0 : i32
    %c0_i32_1 = arith.constant 0 : i32
    return %arg0, %c0_i32, %c0_i32_0 : i32, i32, i32
  }
}

</mosaic_0001>

<bundles_post_ra>
// kernel: tpu_custom_call.1
= control target key start
LH: loop header
LB: loop body
LE: loop exit
PB: predicated region body
PF: predicated region fallthrough
CT: control target
= control target key end

     0   :  { %7 = vsyncpa [#allocation3], 0  ;;  %s243_s0 = inlined_call_operand.hbm [shape: f32[8,128], index: 0, kind: input, shape index: {}]   ;;  %s244_s1 = inlined_call_operand.hbm [shape: f32[8,128], index: 1, kind: input, shape index: {}]   ;;  %s245_s2 = inlined_call_operand.hbm [shape: f32[1,8,128], index: 2, kind: output, shape index: {}]  }
   0x1   :  { %8 = vsyncpa [#allocation6], 0 }
   0x2   :  { %9 = vsyncpa [#allocation4], 0  ;;  %s188_s9 = smov [#allocation2]   ;;  %s189_s11 = smov [#allocation5]  }
   0x3   :  { %s21_s10 = sshll.u32 %s188_s9, 4  ;;  %s36_s12 = sshll.u32 %s189_s11, 4  ;;  %s22_s10 = int_to_ptr.vmem [resolvable:$true] %s21_s10  ;;  %s37_s12 = int_to_ptr.vmem [resolvable:$true] %s36_s12 }
   0x4   :  { %s116_s15 = scalar_lea.hbm %s243_s0, 128 }
   0x5   :  { %p117_p0 = scmp.ne.s32.totalorder %s243_s0, %s116_s15  ;;  %p120_p1 = scmp.lt.u32.totalorder %s116_s15, %s243_s0 }
   0x7   :  { %p122_p2 = pnand %p120_p1, %p117_p0 }
   0x9   :  { %125 = shalt.err (!%p122_p2)
}
   0xa   :  { %s126_s20 = scalar_lea.vmem %s22_s10, 128  ;;  %p131_p4 = scmp.lt.s32.totalorder %s22_s10, %s22_s10 }
   0xb   :  { %p127_p3 = scmp.ne.s32.totalorder %s22_s10, %s126_s20  ;;  %p132_p5 = scmp.lt.s32.totalorder %s126_s20, %s126_s20 }
   0xd   :  { %p133_p6 = por %p132_p5, %p131_p4 }
   0xf   :  { %p134_p7 = pnand %p133_p6, %p127_p3 }
  0x11   :  { %137 = shalt.err (!%p134_p7)
}
  0x12   :  { %24 = dma.hbm_to_vmem [thread:$0]  %s243_s0, 128, %s22_s10, [#allocation3]  }
  0x13   :  { %s138_s25 = scalar_lea.hbm %s244_s1, 128 }
  0x14   :  { %p139_p8 = scmp.ne.s32.totalorder %s244_s1, %s138_s25  ;;  %p142_p9 = scmp.lt.u32.totalorder %s138_s25, %s244_s1 }
  0x16   :  { %p144_p10 = pnand %p142_p9, %p139_p8 }
  0x18   :  { %147 = shalt.err (!%p144_p10)
}
  0x19   :  { %s148_s30 = scalar_lea.vmem %s37_s12, 128  ;;  %p153_p12 = scmp.lt.s32.totalorder %s37_s12, %s37_s12 }
  0x1a   :  { %p149_p11 = scmp.ne.s32.totalorder %s37_s12, %s148_s30  ;;  %p154_p13 = scmp.lt.s32.totalorder %s148_s30, %s148_s30 }
  0x1c   :  { %p155_p0 = por %p154_p13, %p153_p12 }
  0x1e   :  { %p156_p1 = pnand %p155_p0, %p149_p11 }
  0x20   :  { %159 = shalt.err (!%p156_p1)
}
  0x21   :  { %39 = dma.hbm_to_vmem [thread:$0]  %s244_s1, 128, %s37_s12, [#allocation6]  }
  0x22   :  { %182 = dma.done.wait [#allocation3], 128  }
  0x23   :  { %183 = vsyncadd [#allocation3], 4294967168 }
  0x24   :  { %184 = dma.done.wait [#allocation6], 128  }
  0x25   :  { %185 = vsyncadd [#allocation6], 4294967168  ;;  %v57_v0 = vld [vmem:[#allocation2] sm:$0xff]  ;;  %v58_v1 = vld [vmem:[#allocation5] sm:$0xff]  ;;  %s190_s4 = smov 2   ;;  %s191_s5 = smov [#allocation7]  }
  0x26   :  { %v59_v2 = vsub.f32 %v57_v0, %v58_v1  ;;  %s97_s6 = sshll.u32 %s191_s5, 4  ;;  %s98_s6 = int_to_ptr.vmem [resolvable:$true] %s97_s6 }
  0x27   :  { %s160_s7 = scalar_lea.vmem %s98_s6, 128  ;;  %p165_p3 = scmp.lt.s32.totalorder %s98_s6, %s98_s6 }
  0x28   :  { %60 = vrot.lane.b32.xlu0 %v59_v2, %s190_s4  ;;  %p161_p2 = scmp.ne.s32.totalorder %s98_s6, %s160_s7  ;;  %p166_p4 = scmp.lt.s32.totalorder %s160_s7, %s160_s7 }
  0x2a   :  { %p167_p5 = por %p166_p4, %p165_p3 }
  0x2c   :  { %p168_p6 = pnand %p167_p5, %p161_p2 }
  0x9a   :  { %v61_v3 = vpop.permute.xlu0 %60 }
  0x9b   :  { %v62_v4 = vsub.f32 %v59_v2, %v61_v3 }
  0x9d   :  { %v63_v5 = vmul.f32 %v62_v4, %v62_v4 }
  0x9f   :  { %75 = vst [vmem:[#allocation7] sm:$0xff] %v63_v5 }
  0xa0   :  { %171 = shalt.err (!%p168_p6)
}
  0xa1   :  { %s172_s9 = scalar_lea.hbm %s245_s2, 128 }
  0xa2   :  { %p173_p7 = scmp.ne.s32.totalorder %s245_s2, %s172_s9  ;;  %p176_p8 = scmp.lt.u32.totalorder %s172_s9, %s245_s2 }
  0xa4   :  { %p178_p9 = pnand %p176_p8, %p173_p7 }
  0xa6   :  { %181 = shalt.err (!%p178_p9)
}
  0xa7   :  { %100 = dma.vmem_to_hbm [thread:$0]  %s98_s6, 128, %s245_s2, [#allocation4]  }
  0xa8   :  { %186 = dma.done.wait [#allocation4], 128  }
  0xa9   :  { %187 = vsyncadd [#allocation4], 4294967168 }
  0xaa   :  { %104 = vsyncpa [#allocation3], 1 }
  0xab   :  { %105 = vsyncpa [#allocation6], 1 }
  0xac   :  { %106 = vsyncpa [#allocation4], 1 }

</bundles_post_ra>
